<compile_context>
chip_gen: v7x
topology: tpu7x:2x2x1
jax: 0.10.0
libtpu: 0.0.40
codegen_flags: <defaults>
</compile_context>

<pallas_src>
import functools

import jax
import jax.numpy as jnp
from jax.experimental import pallas as pl
from jax.experimental.pallas import tpu as pltpu

LN_EPS = 1e-5  # PyTorch nn.LayerNorm default


def _round_up(x: int, m: int) -> int:
    return (x + m - 1) // m * m


# ---- VMEM capacity (trace-time query; conservative v7x fallback). -------------------
try:
    _VMEM_CAP_BYTES = int(pltpu.get_tpu_info().vmem_capacity_bytes)
    if _VMEM_CAP_BYTES < (32 << 20):
        _VMEM_CAP_BYTES = 64 << 20
except Exception:  # pragma: no cover - query unavailable
    _VMEM_CAP_BYTES = 64 << 20  # v7x has the smallest VMEM; safe on v5e/v6e too
_DEFAULT_VMEM_BUDGET = (_VMEM_CAP_BYTES * 3) // 4  # headroom for compiler temporaries


def _const_block(shape, index_map):
    """Constant-index block: DMA'd once; request a single VMEM copy (no double buffer)."""
    try:
        return pl.BlockSpec(shape, index_map, pipeline_mode=pl.Buffered(1))
    except (TypeError, AttributeError):  # older API without pipeline_mode
        return pl.BlockSpec(shape, index_map)


# ---- Shared LayerNorm + SiLU epilogue (f32). ----------------------------------------
def _ln_silu(y, gamma, beta, f_true):
    """LayerNorm over the true feature count + SiLU on an f32 (bm, f_pad) tile."""
    f_pad = y.shape[-1]
    if f_true != f_pad:
        # Padded feature columns must not contribute to LayerNorm statistics.
        col = jax.lax.broadcasted_iota(jnp.int32, y.shape, 1)
        mask = col < f_true
        y = jnp.where(mask, y, 0.0)
        mean = jnp.sum(y, axis=-1, keepdims=True) * (1.0 / f_true)
        centered = jnp.where(mask, y - mean, 0.0)
    else:
        mean = jnp.mean(y, axis=-1, keepdims=True)
        centered = y - mean
    var = jnp.sum(centered * centered, axis=-1, keepdims=True) * (1.0 / f_true)
    y_hat = centered * jax.lax.rsqrt(var + LN_EPS)
    y_hat = y_hat * gamma + beta                 # padded cols stay exactly 0
    return y_hat * jax.nn.sigmoid(y_hat)         # SiLU


# ---- Kernel bodies. ------------------------------------------------------------------
def _mlp_resident_kernel(x_ref, w_ref, b_ref, g_ref, beta_ref, o_ref, *, f_true, mm_dtype):
    """Weight fully VMEM-resident; grid = (row_tiles,)."""
    x = x_ref[...]
    if mm_dtype is not None and x.dtype != mm_dtype:
        x = x.astype(mm_dtype)  # in-kernel cast: x streamed from HBM in its original dtype
    y = jnp.dot(x, w_ref[...], preferred_element_type=jnp.float32) + b_ref[...]
    o_ref[...] = _ln_silu(y, g_ref[...], beta_ref[...], f_true).astype(o_ref.dtype)


def _mlp_ktiled_kernel(x_ref, w_ref, b_ref, g_ref, beta_ref, o_ref, acc_ref, *, f_true, mm_dtype):
    """Large-weight fallback: K tiled as last grid axis with an f32 VMEM accumulator."""
    kk = pl.program_id(1)

    @pl.when(kk == 0)
    def _init():
        acc_ref[...] = jnp.zeros_like(acc_ref)

    x = x_ref[...]
    if mm_dtype is not None and x.dtype != mm_dtype:
        x = x.astype(mm_dtype)
    acc_ref[...] += jnp.dot(x, w_ref[...], preferred_element_type=jnp.float32)

    @pl.when(kk == pl.num_programs(1) - 1)
    def _finalize():
        y = acc_ref[...] + b_ref[...]
        o_ref[...] = _ln_silu(y, g_ref[...], beta_ref[...], f_true).astype(o_ref.dtype)


# ---- Wrapper. -------------------------------------------------------------------------
@functools.partial(
    jax.jit,
    static_argnames=("block_rows", "block_k", "matmul_dtype", "out_dtype",
                     "vmem_budget_bytes", "force_k_grid"))
def mlp_layer(x, w, b, gamma, beta, *, block_rows=1024, block_k=512,
              matmul_dtype=jnp.bfloat16, out_dtype=None,
              vmem_budget_bytes=None, force_k_grid=False):
    """Fused SiLU(LayerNorm(x @ w + b)).

    x: (N, in_features); w: (in_features, out_features); b/gamma/beta: (out_features,).
    matmul_dtype=bfloat16 (default) uses the fast MXU path; pass None for f32 parity
    with PyTorch's nn.Linear.
    """
    n, k = x.shape
    k2, f = w.shape
    assert k == k2 and b.shape == (f,) and gamma.shape == (f,) and beta.shape == (f,)

    out_dt = x.dtype if out_dtype is None else jnp.dtype(out_dtype)
    budget = _DEFAULT_VMEM_BUDGET if vmem_budget_bytes is None else int(vmem_budget_bytes)
    mm_dtype = None if matmul_dtype is None else jnp.dtype(matmul_dtype)

    x_bytes = jnp.dtype(x.dtype).itemsize
    mxu_bytes = jnp.dtype(mm_dtype).itemsize if mm_dtype is not None else x_bytes
    out_bytes = jnp.dtype(out_dt).itemsize

    # Weight: wrapper cast (one extra pass over W; read once on the resident path and in
    # steady state the weight would already be stored in mm_dtype).
    w_in = w
    if mm_dtype is not None and w_in.dtype != mm_dtype:
        w_in = w_in.astype(mm_dtype)
    w_bytes = jnp.dtype(w_in.dtype).itemsize

    # Feature padding: keep f as-is when already lane-dense (avoids an output-slice
    # pass); otherwise pad up to the 256-wide MXU of v6e/v7x.
    f_pad = f if f % 128 == 0 else _round_up(f, 256)

    # Row-tile alignment: 8 rows for f32 MXU operands, 16 for bf16, 32 for int8/fp8.
    row_align = max(8, 32 // mxu_bytes)
    bm_cap = max(row_align, min(_round_up(block_rows, row_align), _round_up(n, row_align)))
    bm_cands = [c for c in (1024, 768, 512, 384, 256, 128, 64, 32, 16, 8) if c <= bm_cap]
    if not bm_cands or bm_cands[0] != bm_cap:
        bm_cands = [bm_cap] + bm_cands

    fixed_param_bytes = 3 * f_pad * 4  # bias/gamma/beta f32, single-buffered

    def resident_vmem(bm_):
        return (2 * bm_ * k * x_bytes            # x tile (double-buffered, original dtype)
                + k * f_pad * w_bytes            # weight, resident, single copy
                + fixed_param_bytes
                + 2 * bm_ * f_pad * out_bytes    # output tile (double-buffered)
                + bm_ * f_pad * 4)               # f32 matmul/LN temporaries

    def ktiled_vmem(bm_, kt_):
        return (2 * bm_ * kt_ * x_bytes
                + 2 * kt_ * f_pad * w_bytes      # weight K-tile (double-buffered)
                + fixed_param_bytes
                + 2 * bm_ * f_pad * out_bytes
                + bm_ * f_pad * 4)               # f32 accumulator scratch

    # ---- Choose path + tiles. ----------------------------------------------------------
    use_k_grid = bool(force_k_grid)
    bm = None
    kt = None
    if not use_k_grid:
        for cand in bm_cands:
            if resident_vmem(cand) <= budget:
                bm = cand
                break
        if bm is None:
            use_k_grid = True

    if use_k_grid:
        k_pad = _round_up(k, 128)
        kt_cap = max(128, min(_round_up(block_k, 128), k_pad))
        kt_cands = [t for t in range(kt_cap, 127, -128) if k_pad % t == 0] or [128]
        bm, kt = bm_cands[-1], kt_cands[-1]      # best-effort fallback
        chosen = False
        for bcand in bm_cands:                   # largest bm first: re-streams ~ N / bm
            for tcand in kt_cands:               # then largest kt: fewer grid steps
                if ktiled_vmem(bcand, tcand) <= budget:
                    bm, kt = bcand, tcand
                    chosen = True
                    break
            if chosen:
                break
    else:
        k_pad = k                                # resident path: full-K block, no K padding

    # ---- Wrapper-side padding (only what correctness requires). -----------------------
    n_pad = _round_up(n, bm)
    row_tiles = n_pad // bm

    x_in = x
    pad_rows = n_pad - n
    pad_k = (k_pad - k) if use_k_grid else 0     # zero-pad K so garbage never enters the dot
    if pad_rows or pad_k:
        x_in = jnp.pad(x_in, ((0, pad_rows), (0, pad_k)))
    if pad_k or f_pad != f:
        w_in = jnp.pad(w_in, ((0, pad_k), (0, f_pad - f)))

    def prep_param(p):
        p = p.astype(jnp.float32)
        if f_pad != f:
            p = jnp.pad(p, (0, f_pad - f))       # zero pad -> padded output cols stay 0
        return p.reshape(1, f_pad)

    b_in, g_in, beta_in = prep_param(b), prep_param(gamma), prep_param(beta)

    # ---- Honest cost estimate (counts weight re-streaming on the K-tiled path). -------
    k_used = k_pad if use_k_grid else k
    w_streams = row_tiles if use_k_grid else 1
    cost = pl.CostEstimate(
        flops=2 * n_pad * k_used * f_pad + 10 * n_pad * f_pad,
        transcendentals=n_pad * f_pad + n_pad,   # sigmoid per element + rsqrt per row
        bytes_accessed=(n_pad * k_used * x_bytes
                        + w_streams * k_used * f_pad * w_bytes
                        + fixed_param_bytes
                        + n_pad * f_pad * out_bytes),
    )

    needed = ktiled_vmem(bm, kt) if use_k_grid else resident_vmem(bm)
    vmem_limit = int(min(_VMEM_CAP_BYTES,
                         max(32 << 20, needed + needed // 4 + (4 << 20))))

    # ---- Build pallas_call. ------------------------------------------------------------
    if not use_k_grid:
        grid = (row_tiles,)
        kernel = functools.partial(_mlp_resident_kernel, f_true=f, mm_dtype=mm_dtype)
        in_specs = [
            pl.BlockSpec((bm, k), lambda i: (i, 0)),            # x row tile (pipelined)
            _const_block((k, f_pad), lambda i: (0, 0)),          # weight: resident, 1 copy
            _const_block((1, f_pad), lambda i: (0, 0)),          # bias
            _const_block((1, f_pad), lambda i: (0, 0)),          # ln gamma
            _const_block((1, f_pad), lambda i: (0, 0)),          # ln beta
        ]
        out_spec = pl.BlockSpec((bm, f_pad), lambda i: (i, 0))
        scratch = []
        dim_sem = ("parallel",)
    else:
        grid = (row_tiles, k_pad // kt)                          # reduction axis last
        kernel = functools.partial(_mlp_ktiled_kernel, f_true=f, mm_dtype=mm_dtype)
        in_specs = [
            pl.BlockSpec((bm, kt), lambda i, kk: (i, kk)),       # x tile
            pl.BlockSpec((kt, f_pad), lambda i, kk: (kk, 0)),    # weight K-tile
            _const_block((1, f_pad), lambda i, kk: (0, 0)),      # bias
            _const_block((1, f_pad), lambda i, kk: (0, 0)),      # ln gamma
            _const_block((1, f_pad), lambda i, kk: (0, 0)),      # ln beta
        ]
        out_spec = pl.BlockSpec((bm, f_pad), lambda i, kk: (i, 0))
        scratch = [pltpu.VMEM((bm, f_pad), jnp.float32)]         # f32 accumulator
        dim_sem = ("parallel", "arbitrary")

    out = pl.pallas_call(
        kernel,
        out_shape=jax.ShapeDtypeStruct((n_pad, f_pad), out_dt),
        grid_spec=pltpu.PrefetchScalarGridSpec(
            num_scalar_prefetch=0,
            grid=grid,
            in_specs=in_specs,
            out_specs=out_spec,
            scratch_shapes=scratch,
        ),
        compiler_params=pltpu.CompilerParams(
            dimension_semantics=dim_sem,
            vmem_limit_bytes=vmem_limit,
        ),
        cost_estimate=cost,
    )(x_in, w_in, b_in, g_in, beta_in)

    if (n_pad, f_pad) != (n, f):
        out = out[:n, :f]
    return out


# ---- Pure-JAX reference. ---------------------------------------------------------------
def mlp_layer_ref(x, w, b, gamma, beta, matmul_dtype=None):
    if matmul_dtype is not None:
        x = x.astype(matmul_dtype)
        w = w.astype(matmul_dtype)
    y = jnp.dot(x, w, preferred_element_type=jnp.float32) + b
    mean = jnp.mean(y, axis=-1, keepdims=True)
    var = jnp.mean((y - mean) ** 2, axis=-1, keepdims=True)
    y_hat = (y - mean) * jax.lax.rsqrt(var + LN_EPS) * gamma + beta
    return (y_hat * jax.nn.sigmoid(y_hat)).astype(jnp.float32)


if __name__ == "__main__":
    key = jax.random.PRNGKey(0)
    k1, k2, k3, k4, k5, k6 = jax.random.split(key, 6)

    # ---- Test 1: resident-weight path, bf16 MXU, multiple row tiles (grid=(4,)).
    N, IN_F, OUT_F = 256, 128, 128
    x = jax.random.normal(k1, (N, IN_F), dtype=jnp.float32)
    w = jax.random.normal(k2, (IN_F, OUT_F), dtype=jnp.float32) * (1.0 / IN_F ** 0.5)
    b = jax.random.normal(k3, (OUT_F,), dtype=jnp.float32) * 0.01
    gamma = 1.0 + 0.1 * jax.random.normal(k4, (OUT_F,), dtype=jnp.float32)
    beta = 0.1 * jax.random.normal(k5, (OUT_F,), dtype=jnp.float32)

    out = jax.block_until_ready(mlp_layer(x, w, b, gamma, beta, block_rows=64))
    assert out.shape == (N, OUT_F)
    ref_bf16 = mlp_layer_ref(x, w, b, gamma, beta, matmul_dtype=jnp.bfloat16)
    assert jnp.allclose(out, ref_bf16, atol=2e-3, rtol=2e-3), "test1 vs matched-precision ref"
    ref_f32 = mlp_layer_ref(x, w, b, gamma, beta)
    assert jnp.allclose(out, ref_f32, atol=5e-2, rtol=5e-2), "test1 vs f32 ref"

    # ---- Test 2: ragged N=20 / K=40 / OUT=96 (f padded + masked LayerNorm), f32 path.
    N2, IN2, OUT2 = 20, 40, 96
    x2 = jax.random.normal(k6, (N2, IN2), dtype=jnp.float32)
    w2 = jax.random.normal(k2, (IN2, OUT2), dtype=jnp.float32) * (1.0 / IN2 ** 0.5)
    b2 = jax.random.normal(k3, (OUT2,), dtype=jnp.float32) * 0.01
    g2 = 1.0 + 0.1 * jax.random.normal(k4, (OUT2,), dtype=jnp.float32)
    be2 = 0.1 * jax.random.normal(k5, (OUT2,), dtype=jnp.float32)

    out2 = jax.block_until_ready(mlp_layer(x2, w2, b2, g2, be2, matmul_dtype=None))
    assert out2.shape == (N2, OUT2)
    ref2 = mlp_layer_ref(x2, w2, b2, g2, be2)
    assert jnp.allclose(out2, ref2, atol=1e-3, rtol=1e-3), "test2 vs f32 ref"

    # ---- Test 3: forced K-tiled fallback path (accumulator, K zero-padding), bf16.
    N3, IN3, OUT3 = 64, 200, 128
    x3 = jax.random.normal(k1, (N3, IN3), dtype=jnp.float32)
    w3 = jax.random.normal(k2, (IN3, OUT3), dtype=jnp.float32) * (1.0 / IN3 ** 0.5)
    b3 = jax.random.normal(k3, (OUT3,), dtype=jnp.float32) * 0.01
    g3 = 1.0 + 0.1 * jax.random.normal(k4, (OUT3,), dtype=jnp.float32)
    be3 = 0.1 * jax.random.normal(k5, (OUT3,), dtype=jnp.float32)

    out3 = jax.block_until_ready(
        mlp_layer(x3, w3, b3, g3, be3, block_rows=32, block_k=128, force_k_grid=True))
    assert out3.shape == (N3, OUT3)
    ref3 = mlp_layer_ref(x3, w3, b3, g3, be3, matmul_dtype=jnp.bfloat16)
    assert jnp.allclose(out3, ref3, atol=2e-3, rtol=2e-3), "test3 vs matched-precision ref"

    print("KERNEL_OK")
</pallas_src>

<mosaic_0001>
module attributes {stable_mosaic.version = 11 : i64} {
  func.func @_mlp_resident_kernel(%arg0: i32, %arg1: memref<64x128xf32, #tpu.memory_space<vmem>>, %arg2: memref<128x128xbf16, #tpu.memory_space<vmem>>, %arg3: memref<1x128xf32, #tpu.memory_space<vmem>>, %arg4: memref<1x128xf32, #tpu.memory_space<vmem>>, %arg5: memref<1x128xf32, #tpu.memory_space<vmem>>, %arg6: memref<64x128xf32, #tpu.memory_space<vmem>>) attributes {dimension_semantics = [#tpu.dimension_semantics<parallel>], iteration_bounds = array<i64: 4>, scalar_prefetch = 0 : i64, scratch_operands = 0 : i64, tpu.core_type = #tpu.core_type<tc>, window_params = [{transform_indices = @transform_0, window_bounds = array<i64: 64, 128>}, {pipeline_mode = #tpu.pipeline_mode<synchronous>, transform_indices = @transform_1, window_bounds = array<i64: 128, 128>}, {pipeline_mode = #tpu.pipeline_mode<synchronous>, transform_indices = @transform_2, window_bounds = array<i64: 1, 128>}, {pipeline_mode = #tpu.pipeline_mode<synchronous>, transform_indices = @transform_3, window_bounds = array<i64: 1, 128>}, {pipeline_mode = #tpu.pipeline_mode<synchronous>, transform_indices = @transform_4, window_bounds = array<i64: 1, 128>}, {transform_indices = @transform_5, window_bounds = array<i64: 64, 128>}]} {
    %c0 = arith.constant 0 : index
    %c0_0 = arith.constant 0 : index
    %0 = vector.load %arg1[%c0, %c0_0] : memref<64x128xf32, #tpu.memory_space<vmem>>, vector<64x128xf32>
    %1 = arith.truncf %0 : vector<64x128xf32> to vector<64x128xbf16>
    %c0_1 = arith.constant 0 : index
    %c0_2 = arith.constant 0 : index
    %2 = vector.load %arg2[%c0_1, %c0_2] : memref<128x128xbf16, #tpu.memory_space<vmem>>, vector<128x128xbf16>
    %cst = arith.constant dense<0.000000e+00> : vector<64x128xf32>
    %3 = tpu.matmul %1, %2, %cst {dimension_numbers = #tpu.dot_dimension_numbers<[1], [0], [0], [1], [0, 0, 1, 1], [], []>} : vector<64x128xbf16>, vector<128x128xbf16>, vector<64x128xf32> -> vector<64x128xf32>
    %c0_3 = arith.constant 0 : index
    %c0_4 = arith.constant 0 : index
    %4 = vector.load %arg3[%c0_3, %c0_4] : memref<1x128xf32, #tpu.memory_space<vmem>>, vector<1x128xf32>
    %5 = vector.broadcast %4 : vector<1x128xf32> to vector<64x128xf32>
    %6 = arith.addf %3, %5 : vector<64x128xf32>
    %c0_5 = arith.constant 0 : index
    %c0_6 = arith.constant 0 : index
    %7 = vector.load %arg4[%c0_5, %c0_6] : memref<1x128xf32, #tpu.memory_space<vmem>>, vector<1x128xf32>
    %c0_7 = arith.constant 0 : index
    %c0_8 = arith.constant 0 : index
    %8 = vector.load %arg5[%c0_7, %c0_8] : memref<1x128xf32, #tpu.memory_space<vmem>>, vector<1x128xf32>
    %cst_9 = arith.constant dense<0.000000e+00> : vector<64xf32>
    %9 = vector.multi_reduction <add>, %6, %cst_9 [1] : vector<64x128xf32> to vector<64xf32>
    %10 = vector.shape_cast %9 : vector<64xf32> to vector<64x1xf32>
    %cst_10 = arith.constant 1.280000e+02 : f32
    %11 = vector.broadcast %cst_10 : f32 to vector<64x1xf32>
    %12 = arith.divf %10, %11 : vector<64x1xf32>
    %13 = vector.broadcast %12 : vector<64x1xf32> to vector<64x128xf32>
    %14 = arith.subf %6, %13 : vector<64x128xf32>
    %15 = arith.mulf %14, %14 : vector<64x128xf32>
    %cst_11 = arith.constant dense<0.000000e+00> : vector<64xf32>
    %16 = vector.multi_reduction <add>, %15, %cst_11 [1] : vector<64x128xf32> to vector<64xf32>
    %17 = vector.shape_cast %16 : vector<64xf32> to vector<64x1xf32>
    %cst_12 = arith.constant 7.812500e-03 : f32
    %18 = vector.broadcast %cst_12 : f32 to vector<64x1xf32>
    %19 = arith.mulf %17, %18 : vector<64x1xf32>
    %cst_13 = arith.constant 9.99999974E-6 : f32
    %20 = vector.broadcast %cst_13 : f32 to vector<64x1xf32>
    %21 = arith.addf %19, %20 : vector<64x1xf32>
    %22 = math.rsqrt %21 : vector<64x1xf32>
    %23 = vector.broadcast %22 : vector<64x1xf32> to vector<64x128xf32>
    %24 = arith.mulf %14, %23 : vector<64x128xf32>
    %25 = vector.broadcast %7 : vector<1x128xf32> to vector<64x128xf32>
    %26 = arith.mulf %24, %25 : vector<64x128xf32>
    %27 = vector.broadcast %8 : vector<1x128xf32> to vector<64x128xf32>
    %28 = arith.addf %26, %27 : vector<64x128xf32>
    %29 = arith.negf %28 : vector<64x128xf32>
    %30 = math.exp %29 : vector<64x128xf32>
    %cst_14 = arith.constant 1.000000e+00 : f32
    %31 = vector.broadcast %cst_14 : f32 to vector<64x128xf32>
    %32 = arith.addf %31, %30 : vector<64x128xf32>
    %33 = arith.divf %31, %32 : vector<64x128xf32>
    %34 = arith.mulf %28, %33 : vector<64x128xf32>
    %c0_15 = arith.constant 0 : index
    %c0_16 = arith.constant 0 : index
    %35 = vector.load %arg6[%c0_15, %c0_16] : memref<64x128xf32, #tpu.memory_space<vmem>>, vector<64x128xf32>
    tpu.vector_store %arg6[%c0_15, %c0_16], %34 {strides = array<i32>} : memref<64x128xf32, #tpu.memory_space<vmem>>, vector<64x128xf32>,
    return
  }
  func.func @transform_0(%arg0: i32) -> (i32, i32) {
    %c0_i32 = arith.constant 0 : i32
    %c0_i32_0 = arith.constant 0 : i32
    return %arg0, %c0_i32 : i32, i32
  }
  func.func @transform_1(%arg0: i32) -> (i32, i32) {
    %c0_i32 = arith.constant 0 : i32
    %c0_i32_0 = arith.constant 0 : i32
    %c0_i32_1 = arith.constant 0 : i32
    return %c0_i32, %c0_i32_0 : i32, i32
  }
  func.func @transform_2(%arg0: i32) -> (i32, i32) {
    %c0_i32 = arith.constant 0 : i32
    %c0_i32_0 = arith.constant 0 : i32
    %c0_i32_1 = arith.constant 0 : i32
    return %c0_i32, %c0_i32_0 : i32, i32
  }
  func.func @transform_3(%arg0: i32) -> (i32, i32) {
    %c0_i32 = arith.constant 0 : i32
    %c0_i32_0 = arith.constant 0 : i32
    %c0_i32_1 = arith.constant 0 : i32
    return %c0_i32, %c0_i32_0 : i32, i32
  }
  func.func @transform_4(%arg0: i32) -> (i32, i32) {
    %c0_i32 = arith.constant 0 : i32
    %c0_i32_0 = arith.constant 0 : i32
    %c0_i32_1 = arith.constant 0 : i32
    return %c0_i32, %c0_i32_0 : i32, i32
  }
  func.func @transform_5(%arg0: i32) -> (i32, i32) {
    %c0_i32 = arith.constant 0 : i32
    %c0_i32_0 = arith.constant 0 : i32
    return %arg0, %c0_i32 : i32, i32
  }
}

</mosaic_0001>

<bundles_post_ra>
// kernel: mlp_layer.1
= control target key start
LH: loop header
LB: loop body
LE: loop exit
PB: predicated region body
PF: predicated region fallthrough
CT: control target
= control target key end

     0   :  { %10 = vsyncpa [#allocation3], 0  ;;  %s1244_s0 = inlined_call_operand.hbm [shape: f32[256,128], index: 0, kind: input, shape index: {}]   ;;  %s1245_s1 = inlined_call_operand.vmem [shape: bf16[128,128], index: 1, kind: input, shape index: {}]   ;;  %s1246_s2 = inlined_call_operand.vmem [shape: f32[1,128], index: 2, kind: input, shape index: {}]   ;;  %s1247_s3 = inlined_call_operand.vmem [shape: f32[1,128], index: 3, kind: input, shape index: {}]   ;;  %s1248_s4 = inlined_call_operand.vmem [shape: f32[1,128], index: 4, kind: input, shape index: {}]   ;;  %s1249_s5 = inlined_call_operand.hbm [shape: f32[256,128], index: 5, kind: output, shape index: {}]  }
   0x1   :  { %12 = vsyncpa [#allocation3 + $0x1], 0 }
   0x2   :  { %13 = vsyncpa [#allocation4], 0 }
   0x3   :  { %15 = vsyncpa [#allocation4 + $0x1], 0  ;;  %s991_s18 = smov 0   ;;  %s993_s19 = smov 0  }
   0x4   :  { %s995_s20 = smov 0   ;;  %s997_s21 = smov 0  }
   0x5 LB: > { %s1012_s22 = sadd.s32 4294967295, %s953_s21   ;;  %s664_s23 = sadd.s32 4294967294, %s953_s21   ;;  %s953_s21 = sphi %s997_s21, %s1261_s21   ;;  %s949_s20 = sphi %s995_s20, %s1260_s20   ;;  %s945_s19 = sphi %s993_s19, %s1259_s19   ;;  %s941_s18 = sphi %s991_s18, %s1258_s18  }
   0x6   : > { %s1016_s24 = sadd.s32 1, %s953_s21   ;;  %s28_s25 = sadd.s32 1, %s949_s20 }
   0x7   : > { %s25_s26 = ssub.s32 %s953_s21, %s1016_s24  ;;  %p35_p0 = scmp.ne.s32.totalorder %s949_s20, %s945_s19 }
   0x8   : > { %p26_p1 = scmp.eq.s32.totalorder %s25_s26, 0  ;;  %p36_p2 = scmp.eq.s32.totalorder %s953_s21, 0 }
   0x9   : > { %p41_p3 = scmp.ne.s32.totalorder %s945_s19, %s941_s18  ;;  %p42_p4 = scmp.eq.s32.totalorder %s1012_s22, 0 }
   0xa   : > { %s1028_s27 = scalar_select %p26_p1, %s949_s20, %s28_s25  }
   0xb   : > { %p1030_p5 = por %p36_p2, %p35_p0  ;;  %p1034_p6 = por %p42_p4, %p41_p3 }
   0xc   : > { %p149_p7 = scmp.eq.s32.totalorder %s1012_s22, 3  ;;  %p155_p8 = scmp.eq.s32.totalorder %s664_s23, 3 }
   0xd   : > { %p763_p9 = scmp.lt.s32.totalorder %s953_s21, 4  ;;  %s187_s7 = sand.u32 1, %s949_s20  }
   0xe   : > { %p1040_p10 = por %p149_p7, %p35_p0  ;;  %p1044_p11 = por %p155_p8, %p41_p3 }
   0xf   : > { %s697_s8 = sshll.u32 %s953_s21, 10  ;;  %s667_s9 = sshll.u32 %s187_s7, 6 }
  0x10   : > { %s1253_s30 = scalar_select %p1040_p10, 1, 0 }
  0x11   : > { %s1254_s6 = scalar_select %p1044_p11, 1, 0 }
  0x12   : > { %s1053_s12 = scalar_lea.hbm %s1244_s0, %s697_s8  ;;  %s191_s13 = scalar_lea.vmem [#allocation2], %s667_s9 }
  0x13   : > { %s198_s14 = sshll.u32 %s191_s13, 4  ;;  %p1057_p12 = pnand %p763_p9, %p1030_p5  ;;  %s1061_s14 = int_to_ptr.vmem [resolvable:$true] %s198_s14 }
  0x14   : > { %s1063_s16 = scalar_lea.sflag [#allocation3], %s187_s7  ;;  %s857_s17 = scalar_lea.hbm %s1053_s12, 1024 }
  0x15   : > { %p858_p13 = scmp.ne.s32.totalorder %s1053_s12, %s857_s17  ;;  %p859_p0 = pneg %p1057_p12 }
  0x16   : > { %s862_s26 = scalar_lea.hbm %s1244_s0, 4096  ;;  %p863_p3 = scmp.lt.u32.totalorder %s1053_s12, %s1244_s0 }
  0x17   : > { %p860_p1 = pnand %p859_p0, %p858_p13  ;;  %p864_p4 = scmp.lt.u32.totalorder %s862_s26, %s857_s17 }
  0x18   : > { %p866_p7 = scmp.lt.u32.totalorder %s857_s17, %s1053_s12 }
  0x19   : > { %p861_p2 = pneg %p860_p1  ;;  %p865_p5 = por %p864_p4, %p863_p3 }
  0x1b   : > { %p867_p8 = por %p866_p7, %p865_p5 }
  0x1d   : > { %p868_p9 = pnand %p867_p8, %p861_p2 }
  0x1f   : > { %871 = shalt.err (!%p868_p9)
}
  0x20   : > { %s872_s7 = scalar_lea.vmem %s1061_s14, 1024  ;;  %s955_s9 = smov [#allocation2]  }
  0x21   : > { %p873_p13 = scmp.ne.s32.totalorder %s1061_s14, %s872_s7  ;;  %s877_s10 = sshll.u32 %s955_s9, 4  ;;  %s878_s10 = int_to_ptr.vmem [resolvable:$false] %s877_s10 }
  0x22   : > { %s879_s11 = scalar_lea.vmem %s878_s10, 2048  ;;  %p880_p10 = scmp.lt.s32.totalorder %s1061_s14, %s878_s10 }
  0x23   : > { %p875_p1 = pnand %p873_p13, %p859_p0  ;;  %p881_p3 = scmp.lt.s32.totalorder %s879_s11, %s872_s7 }
  0x25   : > { %p876_p11 = pneg %p875_p1  ;;  %p882_p4 = por %p881_p3, %p880_p10 }
  0x27   : > { %p883_p5 = pnand %p882_p4, %p876_p11 }
  0x29   : > { %886 = shalt.err (!%p883_p5)
}
  0x2a   : > { %s956_s13 = smov 128   ;;  %s957_s17 = smov 8  }
  0x2b   : > { %758 = dma.hbm_to_vmem [thread:$0]  (!%p1057_p12), %s1053_s12, 1024, %s1061_s14, %s1063_s16, %s956_s13, %s956_s13, %s957_s17  }
  0x2c   : > { %p670_p0 = scmp.ge.s32.totalorder %s953_s21, 1  ;;  %p206_p2 = scmp.lt.s32.totalorder %s953_s21, 5 }
  0x2e   : > { %p207_p7 = pnand %p670_p0, %p206_p2 }
  0x2f   : > { %s1094_s23 = sand.u32 (!%p207_p7), 1, %s945_s19  }
  0x30   : > { %210 = sbr.rel (%p207_p7) target bundleno = 676 (0x2a4), region = 40  ;;  %s671_s25 = sshll.u32 (!%p207_p7), %s1094_s23, 6 }
  0x31   : > { %s213_s26 = scalar_lea.sflag (!%p207_p7), [#allocation3], %s1094_s23  ;;  %s1100_s28 = scalar_lea.vmem (!%p207_p7), [#allocation2], %s671_s25 }
  0x37   : > { %932 = dma.done.wait (%p1034_p6), %s213_s26, 1024  }
  0x38   : > { %934 = vsyncadd (%p1034_p6), %s213_s26, 4294966272  ;;  %v801_v0 = vld [vmem:[%s1245_s1] sm:$0xff]   ;;  %v802_v1 = vld [vmem:[%s1245_s1 + $0x8] sm:$0xff]   ;;  %s1184_s10 = scalar_lea.vmem [#allocation5], %s671_s25  ;;  %s698_s25 = sshll.u32 %s1012_s22, 10 }
  0x39   : > { %711 = vmatprep.subr.bf16.mxu0 %v801_v0  ;;  %735 = vmatprep.subr.bf16.mxu1 %v801_v0  ;;  %v803_v2 = vld [vmem:[%s1245_s1 + $0x10] sm:$0xff]   ;;  %v804_v3 = vld [vmem:[%s1245_s1 + $0x18] sm:$0xff]   ;;  %v246_v4 = vld [vmem:[%s1100_s28] sm:$0xff]  ;;  %s591_s11 = sshll.u32 %s1184_s10, 4  ;;  %s1198_s26 = scalar_lea.hbm %s1249_s5, %s698_s25  ;;  %s1200_s11 = int_to_ptr.vmem [resolvable:$true] %s591_s11 }
  0x3a   : > { %712 = vmatpush3.bf16.msra.mxu0 %v801_v0  ;;  %743 = vmatpush3.bf16.msra.mxu1 %v801_v0  ;;  %v247_v5 = vld [vmem:[%s1100_s28 + $0x8] sm:$0xff]  ;;  %v250_v7 = vld [vmem:[%s1100_s28 + $0x20] sm:$0xff]  ;;  %v807_v12 = vld [vmem:[%s1245_s1 + $0x30] sm:$0xff]   ;;  %s578_s12 = scalar_lea.sflag [#allocation4], %s1094_s23  ;;  %s887_s14 = scalar_lea.vmem %s1200_s11, 1024 }
  0x3b   : > { %713 = vmatprep.subr.bf16.mxu0 %v802_v1  ;;  %736 = vmatprep.subr.bf16.mxu1 %v802_v1  ;;  %v254_v6 = vpack.c.bf16 %v247_v5, %v246_v4  ;;  %v251_v8 = vld [vmem:[%s1100_s28 + $0x28] sm:$0xff]  ;;  %v805_v10 = vld [vmem:[%s1245_s1 + $0x20] sm:$0xff]   ;;  %v808_v13 = vld [vmem:[%s1245_s1 + $0x38] sm:$0xff]   ;;  %p888_p6 = scmp.ne.s32.totalorder %s1200_s11, %s887_s14  ;;  %p1256_p10 = scmp.ne.s32.totalorder %s1253_s30, 0 }
  0x3c   : > { %v256_v9 = vpack.c.bf16 %v251_v8, %v250_v7  ;;  %v806_v11 = vld [vmem:[%s1245_s1 + $0x28] sm:$0xff]   ;;  %v248_v14 = vld [vmem:[%s1100_s28 + $0x10] sm:$0xff]  ;;  %v249_v15 = vld [vmem:[%s1100_s28 + $0x18] sm:$0xff]  ;;  %s958_s22 = smov [#allocation5]  }
  0x3d   : > { %727 = vmatprep.mubr.bf16.mxu0 %v254_v6  ;;  %v252_v16 = vld [vmem:[%s1100_s28 + $0x30] sm:$0xff]  ;;  %v253_v17 = vld [vmem:[%s1100_s28 + $0x38] sm:$0xff]  ;;  %v255_v18 = vpack.c.bf16 %v249_v15, %v248_v14  ;;  %v673_v20 = vld [vmem:[%s1246_s2] ss:$0 sm:$0xff]  ;;  %p889_p11 = pnand %p888_p6, %p1256_p10  ;;  %s891_s15 = sshll.u32 %s958_s22, 4  ;;  %s892_s15 = int_to_ptr.vmem [resolvable:$false] %s891_s15 }
  0x3e   : > { %714 = vmatpush3.bf16.msra.mxu0 %v802_v1  ;;  %744 = vmatpush3.bf16.msra.mxu1 %v802_v1  ;;  %v257_v19 = vpack.c.bf16 %v253_v17, %v252_v16  ;;  %s893_s16 = scalar_lea.vmem %s892_s15, 2048  ;;  %p894_p8 = scmp.lt.s32.totalorder %s1200_s11, %s892_s15 }
  0x3f   : > { %715 = vmatprep.subr.bf16.mxu0 %v803_v2  ;;  %737 = vmatprep.subr.bf16.mxu1 %v803_v2  ;;  %p890_p12 = pneg %p889_p11  ;;  %p895_p9 = scmp.lt.s32.totalorder %s893_s16, %s887_s14 }
  0x40   : > { %731 = vmatprep.mubr.bf16.mxu1 %v256_v9 }
  0x41   : > { %p896_p13 = por %p895_p9, %p894_p8 }
  0x42   : > { %716 = vmatpush3.bf16.msra.mxu0 %v803_v2  ;;  %745 = vmatpush3.bf16.msra.mxu1 %v803_v2 }
  0x43   : > { %717 = vmatprep.subr.bf16.mxu0 %v804_v3  ;;  %738 = vmatprep.subr.bf16.mxu1 %v804_v3  ;;  %p897_p1 = pnand %p896_p13, %p890_p12 }
  0x46   : > { %718 = vmatpush3.bf16.msra.mxu0 %v804_v3  ;;  %746 = vmatpush3.bf16.msra.mxu1 %v804_v3 }
  0x47   : > { %719 = vmatprep.subr.bf16.mxu0 %v805_v10  ;;  %739 = vmatprep.subr.bf16.mxu1 %v805_v10 }
  0x4a   : > { %720 = vmatpush3.bf16.msra.mxu0 %v805_v10  ;;  %747 = vmatpush3.bf16.msra.mxu1 %v805_v10 }
  0x4b   : > { %721 = vmatprep.subr.bf16.mxu0 %v806_v11  ;;  %740 = vmatprep.subr.bf16.mxu1 %v806_v11 }
  0x4e   : > { %722 = vmatpush3.bf16.msra.mxu0 %v806_v11  ;;  %748 = vmatpush3.bf16.msra.mxu1 %v806_v11 }
  0x4f   : > { %723 = vmatprep.subr.bf16.mxu0 %v807_v12  ;;  %741 = vmatprep.subr.bf16.mxu1 %v807_v12 }
  0x52   : > { %724 = vmatpush3.bf16.msra.mxu0 %v807_v12  ;;  %749 = vmatpush3.bf16.msra.mxu1 %v807_v12 }
  0x53   : > { %725 = vmatprep.subr.bf16.mxu0 %v808_v13  ;;  %742 = vmatprep.subr.bf16.mxu1 %v808_v13 }
  0x56   : > { %726 = vmatpush3.bf16.msra.mxu0 %v808_v13  ;;  %750 = vmatpush3.bf16.msra.mxu1 %v808_v13 }
  0x59   : > { %728 = vmatmul.mubr.bf16.vlgmr.msra.gmra.mrb[0].mxu0 %v255_v18  ;;  %732 = vmatmul.mubr.bf16.vlgmr.msra.gmra.mrb[0].mxu1 %v257_v19 }
 0x12c   : > { %v729_v21 = vpop.f32.mrb[0].mxu0  ;;  %v733_v22 = vpop.f32.mrb[0].mxu1 }
 0x12d   : > { %v372_v23 = vadd.f32 %v729_v21, %v673_v20  ;;  %v363_v24 = vpop.f32.mrb[1].mxu0  ;;  %v379_v25 = vpop.f32.mrb[1].mxu1  ;;  %v388_v36 = vadd.f32 %v733_v22, %v673_v20 }
 0x12e   : > { %v364_v26 = vadd.f32 %v673_v20, %v363_v24  ;;  %v730_v27 = vpop.f32.mrb[2].mxu0  ;;  %v734_v28 = vpop.f32.mrb[2].mxu1  ;;  %v380_v31 = vadd.f32 %v673_v20, %v379_v25  ;;  %v682_v25 = vld [vmem:[%s1247_s3] ss:$0 sm:$0xff] }
 0x12f   : > { %400 = vadd.xlane.f32.xlu1 %v372_v23  ;;  %v366_v29 = vpop.f32.mrb[3].mxu0  ;;  %v382_v30 = vpop.f32.mrb[3].mxu1  ;;  %v375_v32 = vadd.f32 %v730_v27, %v673_v20  ;;  %v391_v35 = vadd.f32 %v734_v28, %v673_v20 }
 0x130   : > { %396 = vadd.xlane.f32.xlu0 %v364_v26  ;;  %v383_v33 = vadd.f32 %v673_v20, %v382_v30  ;;  %v367_v34 = vadd.f32 %v673_v20, %v366_v29  ;;  %v683_v29 = vld [vmem:[%s1248_s4] ss:$0 sm:$0xff] }
 0x133   : > { %402 = vadd.xlane.f32.xlu1 %v375_v32 }
 0x134   : > { %404 = vadd.xlane.f32.xlu0 %v380_v31 }
 0x137   : > { %406 = vadd.xlane.f32.xlu1 %v383_v33 }
 0x138   : > { %398 = vadd.xlane.f32.xlu0 %v367_v34 }
 0x13b   : > { %410 = vadd.xlane.f32.xlu1 %v391_v35 }
 0x13c   : > { %408 = vadd.xlane.f32.xlu0 %v388_v36 }
 0x1bc   : > { %v401_v37 = vpop.xlane.xlu1 %400 }
 0x1bd   : > { %v415_v38 = vmul.f32 0.0078125, %v401_v37  ;;  %v397_v39 = vpop.xlane.xlu0 %396 }
 0x1be   : > { %v413_v40 = vmul.f32 0.0078125, %v397_v39 }
 0x1bf   : > { %v423_v41 = vsub.f32 %v372_v23, %v415_v38 }
 0x1c0   : > { %v403_v42 = vpop.xlane.xlu1 %402  ;;  %v1141_v43 = vsub.f32 %v364_v26, %v413_v40 }
 0x1c1   : > { %v416_v44 = vmul.f32 0.0078125, %v403_v42  ;;  %v405_v45 = vpop.xlane.xlu0 %404  ;;  %v431_v46 = vmul.f32 %v423_v41, %v423_v41 }
 0x1c2   : > { %v417_v47 = vmul.f32 0.0078125, %v405_v45  ;;  %v429_v53 = vmul.f32 %v1141_v43, %v1141_v43 }
 0x1c3   : > { %v1143_v48 = vsub.f32 %v375_v32, %v416_v44  ;;  %441 = vadd.xlane.f32.xlu0 %v431_v46 }
 0x1c4   : > { %v407_v49 = vpop.xlane.xlu1 %406  ;;  %v1145_v50 = vsub.f32 %v380_v31, %v417_v47 }
 0x1c5   : > { %v399_v51 = vpop.xlane.xlu0 %398  ;;  %v432_v52 = vmul.f32 %v1143_v48, %v1143_v48  ;;  %v418_v54 = vmul.f32 0.0078125, %v407_v49 }
 0x1c6   : > { %v414_v55 = vmul.f32 0.0078125, %v399_v51  ;;  %v433_v59 = vmul.f32 %v1145_v50, %v1145_v50 }
 0x1c7   : > { %443 = vadd.xlane.f32.xlu1 %v432_v52  ;;  %437 = vadd.xlane.f32.xlu0 %v429_v53  ;;  %v1155_v60 = vsub.f32 %v383_v33, %v418_v54 }
 0x1c8   : > { %v1151_v56 = vsub.f32 %v367_v34, %v414_v55  ;;  %v411_v57 = vpop.xlane.xlu1 %410 }
 0x1c9   : > { %v409_v58 = vpop.xlane.xlu0 %408  ;;  %v420_v61 = vmul.f32 0.0078125, %v411_v57  ;;  %v434_v2 = vmul.f32 %v1155_v60, %v1155_v60 }
 0x1ca   : > { %v419_v62 = vmul.f32 0.0078125, %v409_v58  ;;  %v430_v63 = vmul.f32 %v1151_v56, %v1151_v56 }
 0x1cb   : > { %445 = vadd.xlane.f32.xlu0 %v433_v59  ;;  %v1161_v1 = vsub.f32 %v391_v35, %v420_v61 }
 0x1cc   : > { %v1159_v0 = vsub.f32 %v388_v36, %v419_v62  ;;  %439 = vadd.xlane.f32.xlu1 %v430_v63 }
 0x1cd   : > { %v436_v4 = vmul.f32 %v1161_v1, %v1161_v1 }
 0x1ce   : > { %v435_v3 = vmul.f32 %v1159_v0, %v1159_v0 }
 0x1d0   : > { %447 = vadd.xlane.f32.xlu1 %v434_v2  ;;  %449 = vadd.xlane.f32.xlu0 %v435_v3 }
 0x1d4   : > { %451 = vadd.xlane.f32.xlu1 %v436_v4 }
 0x250   : > { %v442_v5 = vpop.xlane.xlu0 %441 }
 0x251   : > { %v455_v6 = vmul.f32 0.0078125, %v442_v5 }
 0x253   : > { %v463_v7 = vadd.f32 1e-05, %v455_v6 }
 0x254   : > { %v444_v8 = vpop.xlane.xlu1 %443  ;;  %v438_v9 = vpop.xlane.xlu0 %437 }
 0x255   : > { %809 = vrsqrt.f32 %v463_v7  ;;  %v456_v10 = vmul.f32 0.0078125, %v444_v8  ;;  %v453_v11 = vmul.f32 0.0078125, %v438_v9 }
 0x257   : > { %v464_v12 = vadd.f32 1e-05, %v456_v10  ;;  %v461_v13 = vadd.f32 1e-05, %v453_v11 }
 0x258   : > { %v446_v14 = vpop.xlane.xlu0 %445 }
 0x259   : > { %811 = vrsqrt.f32 %v464_v12  ;;  %v457_v15 = vmul.f32 0.0078125, %v446_v14  ;;  %v440_v16 = vpop.xlane.xlu1 %439 }
 0x25a   : > { %813 = vrsqrt.f32 %v461_v13  ;;  %v454_v17 = vmul.f32 0.0078125, %v440_v16 }
 0x25b   : > { %v465_v18 = vadd.f32 1e-05, %v457_v15 }
 0x25c   : > { %v462_v19 = vadd.f32 1e-05, %v454_v17 }
 0x25d   : > { %815 = vrsqrt.f32 %v465_v18  ;;  %v448_v20 = vpop.xlane.xlu1 %447  ;;  %v450_v21 = vpop.xlane.xlu0 %449 }
 0x25e   : > { %817 = vrsqrt.f32 %v462_v19  ;;  %v458_v22 = vmul.f32 0.0078125, %v448_v20  ;;  %v459_v23 = vmul.f32 0.0078125, %v450_v21 }
 0x25f   : > { %v810_v24 = vpop.eup %809 }
 0x260   : > { %v479_v26 = vmul.f32 %v810_v24, %v423_v41  ;;  %v466_v27 = vadd.f32 1e-05, %v458_v22  ;;  %v467_v28 = vadd.f32 1e-05, %v459_v23 }
 0x261   : > { %v452_v30 = vpop.xlane.xlu1 %451 }
 0x262   : > { %v493_v31 = vmul.f32 %v682_v25, %v479_v26  ;;  %819 = vrsqrt.f32 %v466_v27  ;;  %v460_v32 = vmul.f32 0.0078125, %v452_v30 }
 0x263   : > { %v812_v33 = vpop.eup %811  ;;  %821 = vrsqrt.f32 %v467_v28 }
 0x264   : > { %v814_v34 = vpop.eup %813  ;;  %v507_v35 = vadd.f32 %v683_v29, %v493_v31  ;;  %v480_v36 = vmul.f32 %v812_v33, %v1143_v48  ;;  %v468_v37 = vadd.f32 1e-05, %v460_v32 }
 0x265   : > { %v477_v38 = vmul.f32 %v814_v34, %v1141_v43 }
 0x266   : > { %v686_v39 = vmul.f32 -1.442695, %v507_v35  ;;  %v494_v40 = vmul.f32 %v682_v25, %v480_v36  ;;  %823 = vrsqrt.f32 %v468_v37 }
 0x267   : > { %v816_v41 = vpop.eup %815  ;;  %v491_v42 = vmul.f32 %v682_v25, %v477_v38 }
 0x268   : > { %v818_v44 = vpop.eup %817  ;;  %825 = vpow2.f32 %v686_v39  ;;  %v508_v45 = vadd.f32 %v683_v29, %v494_v40  ;;  %v481_v46 = vmul.f32 %v816_v41, %v1145_v50 }
 0x269   : > { %v505_v47 = vadd.f32 %v683_v29, %v491_v42  ;;  %v478_v49 = vmul.f32 %v818_v44, %v1151_v56 }
 0x26a   : > { %v687_v51 = vmul.f32 -1.442695, %v508_v45  ;;  %v495_v52 = vmul.f32 %v682_v25, %v481_v46 }
 0x26b   : > { %v684_v53 = vmul.f32 -1.442695, %v505_v47  ;;  %v492_v48 = vmul.f32 %v682_v25, %v478_v49 }
 0x26c   : > { %v820_v54 = vpop.eup %819  ;;  %827 = vpow2.f32 %v687_v51  ;;  %v509_v43 = vadd.f32 %v683_v29, %v495_v52 }
 0x26d   : > { %v822_v55 = vpop.eup %821  ;;  %829 = vpow2.f32 %v684_v53  ;;  %v506_v57 = vadd.f32 %v683_v29, %v492_v48  ;;  %v482_v58 = vmul.f32 %v820_v54, %v1155_v60 }
 0x26e   : > { %v688_v59 = vmul.f32 -1.442695, %v509_v43  ;;  %v483_v61 = vmul.f32 %v822_v55, %v1159_v0 }
 0x26f   : > { %v685_v62 = vmul.f32 -1.442695, %v506_v57  ;;  %v496_v50 = vmul.f32 %v682_v25, %v482_v58 }
 0x270   : > { %v824_v63 = vpop.eup %823  ;;  %831 = vpow2.f32 %v688_v59  ;;  %v497_v56 = vmul.f32 %v682_v25, %v483_v61 }
 0x271   : > { %833 = vpow2.f32 %v685_v62  ;;  %v510_v2 = vadd.f32 %v683_v29, %v496_v50  ;;  %v484_v3 = vmul.f32 %v824_v63, %v1161_v1 }
 0x272   : > { %v826_v4 = vpop.eup %825  ;;  %v511_v5 = vadd.f32 %v683_v29, %v497_v56 }
 0x273   : > { %v539_v6 = vadd.f32 1.0, %v826_v4  ;;  %v689_v7 = vmul.f32 -1.442695, %v510_v2  ;;  %v498_v8 = vmul.f32 %v682_v25, %v484_v3 }
 0x274   : > { %v690_v9 = vmul.f32 -1.442695, %v511_v5 }
 0x275   : > { %835 = vrcp.f32 %v539_v6  ;;  %v512_v60 = vadd.f32 %v683_v29, %v498_v8 }
 0x276   : > { %v828_v10 = vpop.eup %827  ;;  %837 = vpow2.f32 %v689_v7 }
 0x277   : > { %v830_v0 = vpop.eup %829  ;;  %v540_v11 = vadd.f32 1.0, %v828_v10  ;;  %839 = vpow2.f32 %v690_v9  ;;  %v691_v12 = vmul.f32 -1.442695, %v512_v60 }
 0x278   : > { %v537_v13 = vadd.f32 1.0, %v830_v0 }
 0x279   : > { %841 = vrcp.f32 %v540_v11 }
 0x27a   : > { %v832_v14 = vpop.eup %831  ;;  %843 = vrcp.f32 %v537_v13 }
 0x27b   : > { %v834_v1 = vpop.eup %833  ;;  %v541_v15 = vadd.f32 1.0, %v832_v14  ;;  %845 = vpow2.f32 %v691_v12 }
 0x27c   : > { %v538_v16 = vadd.f32 1.0, %v834_v1 }
 0x27d   : > { %847 = vrcp.f32 %v541_v15 }
 0x27e   : > { %849 = vrcp.f32 %v538_v16 }
 0x27f   : > { %v836_v17 = vpop.eup %835 }
 0x280   : > { %v838_v18 = vpop.eup %837  ;;  %v563_v19 = vmul.f32 %v836_v17, %v507_v35 }
 0x281   : > { %v840_v20 = vpop.eup %839  ;;  %v542_v21 = vadd.f32 1.0, %v838_v18 }
 0x282   : > { %571 = vst [vmem:[%s1184_s10 + $0x10] sm:$0xff] %v563_v19  ;;  %v543_v22 = vadd.f32 1.0, %v840_v20 }
 0x283   : > { %v842_v23 = vpop.eup %841  ;;  %851 = vrcp.f32 %v542_v21 }
 0x284   : > { %v844_v24 = vpop.eup %843  ;;  %v564_v25 = vmul.f32 %v842_v23, %v508_v45  ;;  %853 = vrcp.f32 %v543_v22 }
 0x285   : > { %v846_v26 = vpop.eup %845  ;;  %v561_v27 = vmul.f32 %v844_v24, %v505_v47 }
 0x286   : > { %572 = vst [vmem:[%s1184_s10 + $0x18] sm:$0xff] %v564_v25  ;;  %v544_v28 = vadd.f32 1.0, %v846_v26 }
 0x287   : > { %v848_v29 = vpop.eup %847  ;;  %569 = vst [vmem:[%s1184_s10] sm:$0xff] %v561_v27 }
 0x288   : > { %v850_v30 = vpop.eup %849  ;;  %v565_v31 = vmul.f32 %v848_v29, %v509_v43  ;;  %855 = vrcp.f32 %v544_v28 }
 0x289   : > { %v562_v32 = vmul.f32 %v850_v30, %v506_v57 }
 0x28a   : > { %573 = vst [vmem:[%s1184_s10 + $0x20] sm:$0xff] %v565_v31 }
 0x28b   : > { %570 = vst [vmem:[%s1184_s10 + $0x8] sm:$0xff] %v562_v32 }
 0x28d   : > { %v852_v33 = vpop.eup %851 }
 0x28e   : > { %v854_v34 = vpop.eup %853  ;;  %v566_v35 = vmul.f32 %v852_v33, %v510_v2 }
 0x28f   : > { %v567_v36 = vmul.f32 %v854_v34, %v511_v5 }
 0x290   : > { %574 = vst [vmem:[%s1184_s10 + $0x28] sm:$0xff] %v566_v35 }
 0x291   : > { %575 = vst [vmem:[%s1184_s10 + $0x30] sm:$0xff] %v567_v36 }
 0x292   : > { %v856_v37 = vpop.eup %855 }
 0x293   : > { %v568_v38 = vmul.f32 %v856_v37, %v512_v60 }
 0x295   : > { %576 = vst [vmem:[%s1184_s10 + $0x38] sm:$0xff] %v568_v38 }
 0x296   : > { %900 = shalt.err (!%p897_p1)
}
 0x297   : > { %s901_s29 = scalar_lea.hbm %s1198_s26, 1024  ;;  %s905_s7 = scalar_lea.hbm %s1249_s5, 4096 }
 0x298   : > { %p902_p3 = scmp.ne.s32.totalorder %s1198_s26, %s901_s29  ;;  %p906_p0 = scmp.lt.u32.totalorder %s1198_s26, %s1249_s5 }
 0x299   : > { %p907_p2 = scmp.lt.u32.totalorder %s905_s7, %s901_s29  ;;  %p909_p6 = scmp.lt.u32.totalorder %s901_s29, %s1198_s26 }
 0x29a   : > { %p903_p4 = pnand %p902_p3, %p1256_p10 }
 0x29b   : > { %p908_p7 = por %p907_p2, %p906_p0 }
 0x29c   : > { %p904_p5 = pneg %p903_p4 }
 0x29d   : > { %p910_p11 = por %p909_p6, %p908_p7 }
 0x29f   : > { %p911_p12 = pnand %p910_p11, %p904_p5 }
 0x2a1   : > { %914 = shalt.err (!%p911_p12)
}
 0x2a2   : > { %s959_s25 = smov 128   ;;  %s960_s13 = smov 8  }
 0x2a3   : > { %753 = dma.vmem_to_hbm [thread:$0]  (%p1256_p10), %s1200_s11, 1024, %s1198_s26, %s578_s12, %s959_s25, %s959_s25, %s960_s13  }
 0x2a4 PF: > { %p764_p8 = scmp.ge.s32.totalorder %s953_s21, 2  ;;  %s606_s17 = sand.u32 1, %s941_s18  }
 0x2a5   : > { %p1257_p9 = scmp.ne.s32.totalorder %s1254_s6, 0  ;;  %s607_s14 = scalar_lea.sflag [#allocation4], %s606_s17 }
 0x2a7   : > { %p760_p13 = pnand %p764_p8, %p1257_p9 }
 0x2a9   : > { %936 = dma.done.wait (!%p760_p13), %s607_s14, 1024  }
 0x2aa   : > { %938 = vsyncadd (!%p760_p13), %s607_s14, 4294966272  ;;  %p18_p1 = scmp.ge.s32.totalorder %s1016_s24, 6   ;;  %s1258_s18 = smov %s945_s19 }
 0x2ab   : > { %s1259_s19 = smov %s949_s20  ;;  %s1260_s20 = smov %s1028_s27 }
 0x2ac   : > { %s1261_s21 = smov %s1016_s24  ;;  %20 = sbr.rel (!%p18_p1) target bundleno = 5 (0x5), region = 85 }
 0x2b3   :  { %612 = vsyncpa [#allocation3], 1 }
 0x2b4   :  { %614 = vsyncpa [#allocation3 + $0x1], 1 }
 0x2b5   :  { %615 = vsyncpa [#allocation4], 1 }
 0x2b6   :  { %617 = vsyncpa [#allocation4 + $0x1], 1 }

</bundles_post_ra>
